<compile_context>
chip_gen: v5e
topology: v5e:2x2
jax: 0.10.0
libtpu: 0.0.40
codegen_flags: <defaults>
</compile_context>

<pallas_src>
import functools

import jax
import jax.numpy as jnp
from jax.experimental import pallas as pl
from jax.experimental.pallas import tpu as pltpu


def _round_up(n, m):
    return ((n + m - 1) // m) * m


def _head_kernel(x_ref, w_ref, b_ref, eps_ref,
                 mu_ref, lv_ref, z_ref, p_ref,
                 *, d_out, clamp_lo, clamp_hi, inv_temperature):
    # bf16 MXU operands (w_ref already stored as bf16), f32 accumulation.
    x = x_ref[...].astype(jnp.bfloat16)
    h = jnp.dot(x, w_ref[...], preferred_element_type=jnp.float32)
    h = h + b_ref[...]                              # bias add in f32

    mu = h[:, :d_out]
    logvar = jnp.clip(h[:, d_out:], clamp_lo, clamp_hi)

    # reparameterize: z = mu + eps * exp(0.5 * logvar)   (f32 elementwise)
    std = jnp.exp(0.5 * logvar)
    z = mu + eps_ref[...].astype(jnp.float32) * std

    # probs = softmax(z / temperature, axis=-1); exact divide for correctness.
    zt = z * inv_temperature
    zt_max = jnp.max(zt, axis=-1, keepdims=True)
    e = jnp.exp(zt - zt_max)
    denom = jnp.sum(e, axis=-1, keepdims=True)
    probs = e / denom

    # Direct stores into the four pipelined output buffers (no concat temp).
    mu_ref[...] = mu.astype(mu_ref.dtype)
    lv_ref[...] = logvar.astype(lv_ref.dtype)
    z_ref[...] = z.astype(z_ref.dtype)
    p_ref[...] = probs.astype(p_ref.dtype)


def emotion_uncertainty_head_v5(x, w_cat, b_cat, eps,
                                logvar_clamp_range=(-3.0, 3.0),
                                temperature=1.5,
                                max_block_b=2048,
                                vmem_budget_bytes=28 * 1024 * 1024):
    """Pallas forward for EmotionUncertaintyHeadV5.

    x     : [B, D_in]        float32
    w_cat : [D_in, 2*D_out]  bfloat16  fused [W_mu | W_lv] (from fuse_params)
    b_cat : [1, 2*D_out]     float32   fused [b_mu | b_lv]
    eps   : [B, D_out]       bfloat16  standard-normal noise (torch.randn_like)
    returns (mu, logvar, z, probs), each [B, D_out] float32
    """
    B, d_in = x.shape
    two_d_out = w_cat.shape[1]
    d_out = two_d_out // 2
    assert eps.shape == (B, d_out)

    # ---- VMEM-budgeted batch tile --------------------------------------
    out_bytes_per_row = 4 * d_out * 4                   # four f32 output rows
    bytes_per_row = (2 * d_in * x.dtype.itemsize        # double-buffered x
                     + 2 * d_out * eps.dtype.itemsize   # double-buffered eps
                     + 2 * out_bytes_per_row)           # double-buffered outs
    fixed_bytes = (2 * d_in * two_d_out * w_cat.dtype.itemsize   # weight (x2)
                   + 2 * two_d_out * b_cat.dtype.itemsize)
    tb_budget = max(16, (vmem_budget_bytes - fixed_bytes) // max(bytes_per_row, 1))
    tb = int(min(max_block_b, tb_budget, B))
    if B >= 32:
        # >= 2 grid steps so v7x's second TensorCore gets work (free elsewhere).
        tb = min(tb, _round_up(pl.cdiv(B, 2), 16))
    if tb < B:
        tb = max(16, (tb // 16) * 16)    # sublane alignment (f32 & bf16 safe)
    grid = (pl.cdiv(B, tb),)

    working_set = int(fixed_bytes + tb * bytes_per_row)
    vmem_limit = int(min(128 * 1024 * 1024,
                         max(32 * 1024 * 1024, 2 * working_set)))

    kernel = functools.partial(
        _head_kernel,
        d_out=d_out,
        clamp_lo=float(logvar_clamp_range[0]),
        clamp_hi=float(logvar_clamp_range[1]),
        inv_temperature=1.0 / float(temperature),
    )

    out_sds = jax.ShapeDtypeStruct((B, d_out), jnp.float32)
    row_spec = pl.BlockSpec((tb, d_out), lambda i: (i, 0))

    mu, logvar, z, probs = pl.pallas_call(
        kernel,
        out_shape=(out_sds, out_sds, out_sds, out_sds),
        grid_spec=pltpu.PrefetchScalarGridSpec(
            num_scalar_prefetch=0,
            grid=grid,
            in_specs=[
                pl.BlockSpec((tb, d_in), lambda i: (i, 0)),          # x tile
                pl.BlockSpec((d_in, two_d_out), lambda i: (0, 0)),   # fused W (bf16)
                pl.BlockSpec((1, two_d_out), lambda i: (0, 0)),      # fused bias
                pl.BlockSpec((tb, d_out), lambda i: (i, 0)),         # eps tile
            ],
            out_specs=(row_spec, row_spec, row_spec, row_spec),
        ),
        compiler_params=pltpu.CompilerParams(
            dimension_semantics=("parallel",),
            vmem_limit_bytes=vmem_limit,
        ),
    )(x, w_cat, b_cat, eps)

    return mu, logvar, z, probs


def _xavier_uniform(key, shape_out_in, gain):
    """Matches nn.init.xavier_uniform_ on a torch Linear weight [out, in]."""
    fan_out, fan_in = shape_out_in
    bound = gain * (6.0 / (fan_in + fan_out)) ** 0.5
    return jax.random.uniform(key, shape_out_in, jnp.float32, -bound, bound)


def init_params(key, input_dim, output_dim):
    k_mu, k_lv = jax.random.split(key)
    # torch stores Linear weight as [out, in]; transpose for x @ W.
    w_mu = jnp.transpose(_xavier_uniform(k_mu, (output_dim, input_dim), 0.5))
    w_lv = jnp.transpose(_xavier_uniform(k_lv, (output_dim, input_dim), 0.1))
    b_mu = jnp.zeros((1, output_dim), jnp.float32)        # constant 0.0
    b_lv = jnp.full((1, output_dim), -1.0, jnp.float32)   # constant -1.0
    return w_mu, b_mu, w_lv, b_lv


def fuse_params(w_mu, b_mu, w_lv, b_lv):
    """One-time fusion done at init: bf16 [D_in, 2*D_out] weight, f32 bias."""
    d_out = w_mu.shape[1]
    w_cat = jnp.concatenate([w_mu, w_lv], axis=1).astype(jnp.bfloat16)
    b_cat = jnp.concatenate([b_mu.reshape(1, d_out),
                             b_lv.reshape(1, d_out)], axis=1).astype(jnp.float32)
    return w_cat, b_cat


if __name__ == "__main__":
    input_dim = 32
    output_dim = 16
    batch = 8

    root = jax.random.PRNGKey(0)
    k_param, k_x, k_eps = jax.random.split(root, 3)

    w_mu, b_mu, w_lv, b_lv = init_params(k_param, input_dim, output_dim)
    w_cat, b_cat = fuse_params(w_mu, b_mu, w_lv, b_lv)   # once, at init time

    x = jax.random.normal(k_x, (batch, input_dim), jnp.float32)
    # Noise stream kept in bf16 (pure noise); upcast inside the kernel.
    eps = jax.random.normal(k_eps, (batch, output_dim), jnp.float32).astype(jnp.bfloat16)

    mu, logvar, z, probs = emotion_uncertainty_head_v5(
        x, w_cat, b_cat, eps,
        logvar_clamp_range=(-3.0, 3.0), temperature=1.5)
    jax.block_until_ready((mu, logvar, z, probs))

    # --- reference with the same bf16-stored weights / bf16 noise ---------
    eps_f32 = eps.astype(jnp.float32)
    h_ref = jnp.dot(x.astype(jnp.bfloat16), w_cat,
                    preferred_element_type=jnp.float32) + b_cat
    mu_ref = h_ref[:, :output_dim]
    lv_ref = jnp.clip(h_ref[:, output_dim:], -3.0, 3.0)
    z_ref = mu_ref + eps_f32 * jnp.exp(0.5 * lv_ref)
    p_ref = jax.nn.softmax(z_ref / 1.5, axis=-1)

    assert jnp.allclose(mu, mu_ref, atol=1e-4), "mu mismatch"
    assert jnp.allclose(logvar, lv_ref, atol=1e-4), "logvar mismatch"
    assert jnp.allclose(z, z_ref, atol=1e-4), "z mismatch"
    assert jnp.allclose(probs, p_ref, atol=1e-4), "probs mismatch"
    assert jnp.allclose(jnp.sum(probs, axis=-1), 1.0, atol=1e-4), "probs not normalized"

    # Loose sanity check vs. the full-f32 torch-equivalent math (bf16 MXU
    # operands introduce small deviations at these magnitudes).
    mu_f32 = x @ w_mu + b_mu
    lv_f32 = jnp.clip(x @ w_lv + b_lv, -3.0, 3.0)
    z_f32 = mu_f32 + eps_f32 * jnp.exp(0.5 * lv_f32)
    p_f32 = jax.nn.softmax(z_f32 / 1.5, axis=-1)
    assert jnp.allclose(mu, mu_f32, atol=1e-1), "mu far from f32 reference"
    assert jnp.allclose(probs, p_f32, atol=2e-2), "probs far from f32 reference"

    print("KERNEL_OK")
</pallas_src>

<mosaic_0001>
module attributes {stable_mosaic.version = 11 : i64} {
  func.func @_head_kernel(%arg0: i32, %arg1: memref<8x32xf32, #tpu.memory_space<vmem>>, %arg2: memref<32x32xbf16, #tpu.memory_space<vmem>>, %arg3: memref<1x32xf32, #tpu.memory_space<vmem>>, %arg4: memref<8x16xbf16, #tpu.memory_space<vmem>>, %arg5: memref<8x16xf32, #tpu.memory_space<vmem>>, %arg6: memref<8x16xf32, #tpu.memory_space<vmem>>, %arg7: memref<8x16xf32, #tpu.memory_space<vmem>>, %arg8: memref<8x16xf32, #tpu.memory_space<vmem>>) attributes {dimension_semantics = [#tpu.dimension_semantics<parallel>], iteration_bounds = array<i64: 1>, scalar_prefetch = 0 : i64, scratch_operands = 0 : i64, tpu.core_type = #tpu.core_type<tc>, window_params = [{transform_indices = @transform_0, window_bounds = array<i64: 8, 32>}, {pipeline_mode = #tpu.pipeline_mode<synchronous>, transform_indices = @transform_1, window_bounds = array<i64: 32, 32>}, {pipeline_mode = #tpu.pipeline_mode<synchronous>, transform_indices = @transform_2, window_bounds = array<i64: 1, 32>}, {transform_indices = @transform_3, window_bounds = array<i64: 8, 16>}, {transform_indices = @transform_4, window_bounds = array<i64: 8, 16>}, {transform_indices = @transform_5, window_bounds = array<i64: 8, 16>}, {transform_indices = @transform_6, window_bounds = array<i64: 8, 16>}, {transform_indices = @transform_7, window_bounds = array<i64: 8, 16>}]} {
    %c0 = arith.constant 0 : index
    %c0_0 = arith.constant 0 : index
    %0 = vector.load %arg1[%c0, %c0_0] : memref<8x32xf32, #tpu.memory_space<vmem>>, vector<8x32xf32>
    %1 = arith.truncf %0 : vector<8x32xf32> to vector<8x32xbf16>
    %c0_1 = arith.constant 0 : index
    %c0_2 = arith.constant 0 : index
    %2 = vector.load %arg2[%c0_1, %c0_2] : memref<32x32xbf16, #tpu.memory_space<vmem>>, vector<32x32xbf16>
    %cst = arith.constant dense<0.000000e+00> : vector<8x32xf32>
    %3 = tpu.matmul %1, %2, %cst {dimension_numbers = #tpu.dot_dimension_numbers<[1], [0], [0], [1], [0, 0, 1, 1], [], []>} : vector<8x32xbf16>, vector<32x32xbf16>, vector<8x32xf32> -> vector<8x32xf32>
    %c0_3 = arith.constant 0 : index
    %c0_4 = arith.constant 0 : index
    %4 = vector.load %arg3[%c0_3, %c0_4] : memref<1x32xf32, #tpu.memory_space<vmem>>, vector<1x32xf32>
    %5 = vector.broadcast %4 : vector<1x32xf32> to vector<8x32xf32>
    %6 = arith.addf %3, %5 : vector<8x32xf32>
    %7 = vector.extract_strided_slice %6 {offsets = [0, 0], sizes = [8, 16], strides = [1, 1]} : vector<8x32xf32> to vector<8x16xf32>
    %8 = vector.extract_strided_slice %6 {offsets = [0, 16], sizes = [8, 16], strides = [1, 1]} : vector<8x32xf32> to vector<8x16xf32>
    %cst_5 = arith.constant -3.000000e+00 : f32
    %cst_6 = arith.constant 3.000000e+00 : f32
    %9 = vector.broadcast %cst_5 : f32 to vector<8x16xf32>
    %10 = arith.maximumf %9, %8 : vector<8x16xf32>
    %11 = vector.broadcast %cst_6 : f32 to vector<8x16xf32>
    %12 = arith.minimumf %11, %10 : vector<8x16xf32>
    %cst_7 = arith.constant 5.000000e-01 : f32
    %13 = vector.broadcast %cst_7 : f32 to vector<8x16xf32>
    %14 = arith.mulf %13, %12 : vector<8x16xf32>
    %15 = math.exp %14 : vector<8x16xf32>
    %c0_8 = arith.constant 0 : index
    %c0_9 = arith.constant 0 : index
    %16 = vector.load %arg4[%c0_8, %c0_9] : memref<8x16xbf16, #tpu.memory_space<vmem>>, vector<8x16xbf16>
    %17 = arith.extf %16 : vector<8x16xbf16> to vector<8x16xf32>
    %18 = arith.mulf %17, %15 : vector<8x16xf32>
    %19 = arith.addf %7, %18 : vector<8x16xf32>
    %cst_10 = arith.constant 0.666666686 : f32
    %20 = vector.broadcast %cst_10 : f32 to vector<8x16xf32>
    %21 = arith.mulf %19, %20 : vector<8x16xf32>
    %cst_11 = arith.constant dense<0xFF800000> : vector<8xf32>
    %22 = vector.multi_reduction <maximumf>, %21, %cst_11 [1] : vector<8x16xf32> to vector<8xf32>
    %23 = vector.shape_cast %22 : vector<8xf32> to vector<8x1xf32>
    %24 = vector.broadcast %23 : vector<8x1xf32> to vector<8x16xf32>
    %25 = arith.subf %21, %24 : vector<8x16xf32>
    %26 = math.exp %25 : vector<8x16xf32>
    %cst_12 = arith.constant dense<0.000000e+00> : vector<8xf32>
    %27 = vector.multi_reduction <add>, %26, %cst_12 [1] : vector<8x16xf32> to vector<8xf32>
    %28 = vector.shape_cast %27 : vector<8xf32> to vector<8x1xf32>
    %29 = vector.broadcast %28 : vector<8x1xf32> to vector<8x16xf32>
    %30 = arith.divf %26, %29 : vector<8x16xf32>
    %c0_13 = arith.constant 0 : index
    %c0_14 = arith.constant 0 : index
    %31 = vector.load %arg5[%c0_13, %c0_14] : memref<8x16xf32, #tpu.memory_space<vmem>>, vector<8x16xf32>
    tpu.vector_store %arg5[%c0_13, %c0_14], %7 {strides = array<i32>} : memref<8x16xf32, #tpu.memory_space<vmem>>, vector<8x16xf32>,
    %c0_15 = arith.constant 0 : index
    %c0_16 = arith.constant 0 : index
    %32 = vector.load %arg6[%c0_15, %c0_16] : memref<8x16xf32, #tpu.memory_space<vmem>>, vector<8x16xf32>
    tpu.vector_store %arg6[%c0_15, %c0_16], %12 {strides = array<i32>} : memref<8x16xf32, #tpu.memory_space<vmem>>, vector<8x16xf32>,
    %c0_17 = arith.constant 0 : index
    %c0_18 = arith.constant 0 : index
    %33 = vector.load %arg7[%c0_17, %c0_18] : memref<8x16xf32, #tpu.memory_space<vmem>>, vector<8x16xf32>
    tpu.vector_store %arg7[%c0_17, %c0_18], %19 {strides = array<i32>} : memref<8x16xf32, #tpu.memory_space<vmem>>, vector<8x16xf32>,
    %c0_19 = arith.constant 0 : index
    %c0_20 = arith.constant 0 : index
    %34 = vector.load %arg8[%c0_19, %c0_20] : memref<8x16xf32, #tpu.memory_space<vmem>>, vector<8x16xf32>
    tpu.vector_store %arg8[%c0_19, %c0_20], %30 {strides = array<i32>} : memref<8x16xf32, #tpu.memory_space<vmem>>, vector<8x16xf32>,
    return
  }
  func.func @transform_0(%arg0: i32) -> (i32, i32) {
    %c0_i32 = arith.constant 0 : i32
    %c0_i32_0 = arith.constant 0 : i32
    return %arg0, %c0_i32 : i32, i32
  }
  func.func @transform_1(%arg0: i32) -> (i32, i32) {
    %c0_i32 = arith.constant 0 : i32
    %c0_i32_0 = arith.constant 0 : i32
    %c0_i32_1 = arith.constant 0 : i32
    return %c0_i32, %c0_i32_0 : i32, i32
  }
  func.func @transform_2(%arg0: i32) -> (i32, i32) {
    %c0_i32 = arith.constant 0 : i32
    %c0_i32_0 = arith.constant 0 : i32
    %c0_i32_1 = arith.constant 0 : i32
    return %c0_i32, %c0_i32_0 : i32, i32
  }
  func.func @transform_3(%arg0: i32) -> (i32, i32) {
    %c0_i32 = arith.constant 0 : i32
    %c0_i32_0 = arith.constant 0 : i32
    return %arg0, %c0_i32 : i32, i32
  }
  func.func @transform_4(%arg0: i32) -> (i32, i32) {
    %c0_i32 = arith.constant 0 : i32
    %c0_i32_0 = arith.constant 0 : i32
    return %arg0, %c0_i32 : i32, i32
  }
  func.func @transform_5(%arg0: i32) -> (i32, i32) {
    %c0_i32 = arith.constant 0 : i32
    %c0_i32_0 = arith.constant 0 : i32
    return %arg0, %c0_i32 : i32, i32
  }
  func.func @transform_6(%arg0: i32) -> (i32, i32) {
    %c0_i32 = arith.constant 0 : i32
    %c0_i32_0 = arith.constant 0 : i32
    return %arg0, %c0_i32 : i32, i32
  }
  func.func @transform_7(%arg0: i32) -> (i32, i32) {
    %c0_i32 = arith.constant 0 : i32
    %c0_i32_0 = arith.constant 0 : i32
    return %arg0, %c0_i32 : i32, i32
  }
}

</mosaic_0001>

<bundles_post_ra>
// kernel: tpu_custom_call.1
= control target key start
LH: loop header
LB: loop body
LE: loop exit
PB: predicated region body
PF: predicated region fallthrough
CT: control target
= control target key end

     0   :  { %13 = vsyncpa [#allocation3], 0  ;;  %s506_s0 = inlined_call_operand.hbm [shape: f32[8,32], index: 0, kind: input, shape index: {}]   ;;  %s507_s1 = inlined_call_operand.hbm [shape: bf16[32,32], index: 1, kind: input, shape index: {}]   ;;  %s508_s2 = inlined_call_operand.vmem [shape: f32[1,32], index: 2, kind: input, shape index: {}]   ;;  %s509_s3 = inlined_call_operand.hbm [shape: bf16[8,16], index: 3, kind: input, shape index: {}]   ;;  %s510_s4 = inlined_call_operand.hbm [shape: f32[8,16], index: 4, kind: output, shape index: {0}]   ;;  %s511_s5 = inlined_call_operand.hbm [shape: f32[8,16], index: 5, kind: output, shape index: {1}]   ;;  %s512_s6 = inlined_call_operand.hbm [shape: f32[8,16], index: 6, kind: output, shape index: {2}]   ;;  %s513_s7 = inlined_call_operand.hbm [shape: f32[8,16], index: 7, kind: output, shape index: {3}]  }
   0x1   :  { %14 = vsyncpa [#allocation6], 0 }
   0x2   :  { %15 = vsyncpa [#allocation4], 0 }
   0x3   :  { %16 = vsyncpa [#allocation10], 0  ;;  %s33_s26 = sshll.u32 %s507_s1, 4  ;;  %s34_s26 = int_to_ptr.hbm [resolvable:$true] %s33_s26 }
   0x4   :  { %17 = vsyncpa [#allocation13], 0  ;;  %s426_s27 = smov [#allocation5]   ;;  %s23_s8 = sshll.u32 %s506_s0, 4  ;;  %s24_s8 = int_to_ptr.hbm [resolvable:$true] %s23_s8 }
   0x5   :  { %s35_s28 = sshll.u32 %s426_s27, 4  ;;  %s427_s9 = smov 64   ;;  %s36_s28 = int_to_ptr.vmem [resolvable:$true] %s35_s28 }
   0x6   :  { %s428_s10 = smov 4   ;;  %s429_s11 = smov [#allocation2]  }
   0x7   :  { %41 = dma.hbm_to_vmem [thread:$0]  %s34_s26, 256, %s36_s28, [#allocation6], %s427_s9, %s427_s9, %s428_s10  }
   0x8   :  { %s25_s12 = sshll.u32 %s429_s11, 4  ;;  %s49_s15 = sshll.u32 %s509_s3, 4  ;;  %s26_s12 = int_to_ptr.vmem [resolvable:$true] %s25_s12  ;;  %s50_s15 = int_to_ptr.hbm [resolvable:$true] %s49_s15 }
   0x9   :  { %28 = dma.hbm_to_vmem [thread:$0]  %s24_s8, 128, %s26_s12, [#allocation3]  }
   0xa   :  { %s430_s1 = smov [#allocation7]  }
   0xb   :  { %s51_s16 = sshll.u32 %s430_s1, 4  ;;  %s52_s16 = int_to_ptr.vmem [resolvable:$true] %s51_s16 }
   0xc   :  { %54 = dma.hbm_to_vmem [thread:$0]  %s50_s15, 64, %s52_s16, [#allocation6]  }
   0xd   :  { %416 = dma.done.wait [#allocation3], 128  }
   0xe   :  { %417 = vsyncadd [#allocation3], 4294967168 }
   0xf   :  { %418 = dma.done.wait [#allocation6], 320  }
  0x10   :  { %419 = vsyncadd [#allocation6], 4294966976  ;;  %v230_v0 = vld [vmem:[#allocation5 + $0x8] sm:$0xff]  ;;  %v229_v1 = vld [vmem:[#allocation5] sm:$0xff]  ;;  %vm90_vm0 = vcmask 261120   ;;  %vm121_vm1 = vcmask 130048  }
  0x11   :  { %100 = vmatpush.bf16.msra.mxu0 %v230_v0  ;;  %v68_v2 = vld [vmem:[#allocation2] sm:$0xff]  ;;  %s431_s17 = smov 112   ;;  %v112_v12 = vld [vmem:[#allocation7] sm:$0xf]  ;;  %s161_s19 = sshll.u32 %s510_s4, 4  ;;  %s162_s19 = int_to_ptr.hbm [resolvable:$true] %s161_s19 }
  0x12   :  { %v69_v3 = vpack.c.bf16 %v68_v2, %v68_v2  ;;  %v241_v4 = vld [vmem:[%s508_s2] ss:$0 sm:$0xff]  ;;  %v113_v13 = vunpack.c.l.bf16 %v112_v12  ;;  %s432_s20 = smov [#allocation8]   ;;  %s433_s4 = smov [#allocation12]  }
  0x13   :  { %s159_s21 = sshll.u32 %s432_s20, 4  ;;  %s192_s22 = sshll.u32 %s433_s4, 4  ;;  %s160_s21 = int_to_ptr.vmem [resolvable:$true] %s159_s21  ;;  %s193_s22 = int_to_ptr.vmem [resolvable:$true] %s192_s22 }
  0x14   :  { %s194_s25 = sshll.u32 %s513_s7, 4  ;;  %s434_s26 = smov [#allocation9]   ;;  %s195_s25 = int_to_ptr.hbm [resolvable:$true] %s194_s25 }
  0x15   :  { %101 = vmatpush.bf16.msra.mxu0 %v229_v1  ;;  %s170_s27 = sshll.u32 %s434_s26, 4  ;;  %s172_s30 = sshll.u32 %s511_s5, 4  ;;  %s171_s27 = int_to_ptr.vmem [resolvable:$true] %s170_s27  ;;  %s173_s30 = int_to_ptr.hbm [resolvable:$true] %s172_s30 }
  0x16   :  { %s435_s8 = smov [#allocation11]   ;;  %s183_s12 = sshll.u32 %s512_s6, 4  ;;  %s184_s12 = int_to_ptr.hbm [resolvable:$true] %s183_s12 }
  0x17   :  { %s181_s9 = sshll.u32 %s435_s8, 4  ;;  %s182_s9 = int_to_ptr.vmem [resolvable:$true] %s181_s9 }
  0x18   :  { %227 = vmatmul.msk.bf16.vlgmr.msra.gmra.mxu0 %vm90_vm0, %v69_v3 }
  0x95   :  { %v103_v5 = vpop.f32.mrf.mxu0 }
  0x96   :  { %v104_v6 = vadd.f32 %v241_v4, %v103_v5 }
  0x98   :  { %v228_v7 = vclamps-f32 %v104_v6, 3.0  ;;  %146 = vst.msk [vmem:[#allocation8] sm:$0xff] %vm121_vm1, %v104_v6 }
  0x99   :  { %164 = dma.vmem_to_hbm [thread:$0]  %s160_s21, 128, %s162_s19, [#allocation4]  }
  0x9a   :  { %v109_v8 = vmul.f32 0.5, %v228_v7 }
  0x9c   :  { %v110_v9 = vmul.f32 1.442695, %v109_v8 }
  0x9d   :  { %v105_v10 = vpop.f32.mrf.mxu0 }
  0x9e   :  { %242 = vpow2.f32 %v110_v9 }
  0xa4   :  { %v243_v11 = vpop.eup %242 }
  0xa5   :  { %115 = vrot.lane.b32.xlu0 %v243_v11, %s431_s17 }
 0x117   :  { %v116_v14 = vpop.permute.xlu0 %115 }
 0x118   :  { %v118_v15 = vmul.f32 %v116_v14, %v113_v13 }
 0x11a   :  { %v119_v16 = vadd.f32 %v118_v15, %v104_v6 }
 0x11c   :  { %v120_v17 = vmul.f32 0.6666667, %v119_v16  ;;  %152 = vst.msk [vmem:[#allocation11] sm:$0xff] %vm121_vm1, %v119_v16 }
 0x11e   :  { %v122_v18 = vsel %vm121_vm1, %v120_v17, -inf }
 0x11f   :  { %123 = vmax.xlane.f32.xlu0 %v122_v18 }
 0x192   :  { %v124_v19 = vpop.xlane.xlu0 %123 }
 0x193   :  { %v125_v20 = vsub.f32 %v120_v17, %v124_v19 }
 0x195   :  { %v126_v21 = vmul.f32 1.442695, %v125_v20 }
 0x197   :  { %244 = vpow2.f32 %v126_v21 }
 0x19d   :  { %v245_v22 = vpop.eup %244 }
 0x19e   :  { %v128_v23 = vsel %vm121_vm1, %v245_v22, 0.0 }
 0x19f   :  { %129 = vadd.xlane.f32.xlu1 %v128_v23 }
 0x1b8   :  { %148 = vrot.lane.b32.xlu1 %v228_v7, %s431_s17 }
 0x212   :  { %v130_v24 = vpop.xlane.xlu1 %129 }
 0x213   :  { %246 = vrcp.f32 %v130_v24  ;;  %v142_v28 = vand.u32 2147483648, %v130_v24  ;;  %v140_v30 = vand.u32 2147483647, %v130_v24  ;;  %vm136_vm3 = vweird.f32 %v130_v24 }
 0x215   :  { %v143_v32 = vor.u32 1.1754944e-38, %v142_v28  ;;  %vm141_vm5 = vcmp.eq.f32.partialorder %v140_v30, 8.507059e+37 }
 0x219   :  { %v247_v25 = vpop.eup %246 }
 0x21a   :  { %v132_v26 = vmul.f32 %v247_v25, %v130_v24  ;;  %vm137_vm2 = vweird.f32 %v247_v25 }
 0x21b   :  { %vm138_vm4 = vmor %vm136_vm3, %vm137_vm2 }
 0x21c   :  { %v133_v27 = vsub.f32 1.0, %v132_v26 }
 0x21e   :  { %v134_v29 = vmul.f32 %v247_v25, %v133_v27 }
 0x220   :  { %v135_v31 = vadd.f32 %v247_v25, %v134_v29 }
 0x222   :  { %v139_v33 = vsel %vm138_vm4, %v247_v25, %v135_v31 }
 0x223   :  { %v144_v34 = vsel %vm141_vm5, %v143_v32, %v139_v33 }
 0x224   :  { %v145_v35 = vmul.f32 %v245_v22, %v144_v34 }
 0x226   :  { %153 = vst.msk [vmem:[#allocation12] sm:$0xff] %vm121_vm1, %v145_v35 }
 0x227   :  { %197 = dma.vmem_to_hbm [thread:$0]  %s193_s22, 128, %s195_s25, [#allocation13]  }
 0x22a   :  { %v149_v36 = vpop.permute.xlu1 %148 }
 0x22b   :  { %151 = vst.msk [vmem:[#allocation9] sm:$0xff] %vm121_vm1, %v149_v36 }
 0x22c   :  { %175 = dma.vmem_to_hbm [thread:$0]  %s171_s27, 128, %s173_s30, [#allocation10]  }
 0x22d   :  { %186 = dma.vmem_to_hbm [thread:$0]  %s182_s9, 128, %s184_s12, [#allocation10]  }
 0x22e   :  { %420 = dma.done.wait [#allocation4], 128  }
 0x22f   :  { %421 = vsyncadd [#allocation4], 4294967168 }
 0x230   :  { %422 = dma.done.wait [#allocation10], 256  }
 0x231   :  { %423 = vsyncadd [#allocation10], 4294967040 }
 0x232   :  { %424 = dma.done.wait [#allocation13], 128  }
 0x233   :  { %425 = vsyncadd [#allocation13], 4294967168 }
 0x234   :  { %214 = vsyncpa [#allocation3], 1 }
 0x235   :  { %215 = vsyncpa [#allocation6], 1 }
 0x236   :  { %216 = vsyncpa [#allocation4], 1 }
 0x237   :  { %217 = vsyncpa [#allocation10], 1 }
 0x238   :  { %218 = vsyncpa [#allocation13], 1 }

</bundles_post_ra>
